<compile_context>
chip_gen: v7x
topology: tpu7x:2x2x1
jax: 0.10.0
libtpu: 0.0.40
codegen_flags: <defaults>
</compile_context>

<pallas_src>
import functools
import math

import jax
import jax.numpy as jnp
from jax.experimental import pallas as pl
from jax.experimental.pallas import tpu as pltpu


# ------------------------------- helpers -------------------------------------

@functools.lru_cache(maxsize=None)
def _vmem_limit_bytes():
    """~75% of physical VMEM (96 MiB on v5e/v6e, 48 MiB on v7x's 64 MiB/TC); safe fallback."""
    try:
        info = pltpu.get_tpu_info()
        cap = int(getattr(info, "vmem_capacity_bytes", 0) or 0)
        if cap > 0:
            return max(32 << 20, min(cap * 3 // 4, 100 << 20))
    except Exception:
        pass
    return 48 << 20


def _mosaic_params(dims):
    return pltpu.CompilerParams(dimension_semantics=dims,
                                vmem_limit_bytes=_vmem_limit_bytes())


def _layer_norm(x, gamma, beta, eps=1e-5):
    x = x.astype(jnp.float32)
    mean = jnp.mean(x, axis=-1, keepdims=True)
    var = jnp.mean((x - mean) ** 2, axis=-1, keepdims=True)
    return (x - mean) * jax.lax.rsqrt(var + eps) * gamma + beta


def _pick_tile(n, cap, quanta=(128, 16, 8)):
    """Largest divisor of n <= cap that is a multiple of a preferred quantum."""
    if n <= cap:
        return n
    for q in quanta:
        for t in range(cap - cap % q, 0, -q):
            if n % t == 0:
                return t
    return n  # TODO(synk): ragged-T/F masking path for awkward sizes (falls back to full dim)


# ------------------------ kernel A: LN1 + Q/K/V projection --------------------
# grid = (B, T/tq, 3): the third axis selects which of Wq/Wk/Wv is resident, so only a
# single (C, C) bf16 weight block lives in VMEM per step. LN1(x) is computed once per
# (b, i) tile and cached in scratch. The attention scale is folded into Q here.

def ln_qkv_kernel(x_ref, g_ref, b_ref, w_ref, bias_ref, qkv_ref, xn_sc, *, inv_sqrt_dh):
    n = pl.program_id(2)

    @pl.when(n == 0)
    def _():
        xn_sc[...] = _layer_norm(x_ref[0], g_ref[0], b_ref[0]).astype(jnp.bfloat16)

    proj = jnp.dot(xn_sc[...], w_ref[0],
                   preferred_element_type=jnp.float32) + bias_ref[0, 0]
    scale = jnp.where(n == 0, inv_sqrt_dh, 1.0)     # scale only the Q projection
    qkv_ref[0, 0] = (proj * scale).astype(qkv_ref.dtype)


def run_ln_qkv(x, p, num_heads, t_tile):
    B, T, C = x.shape
    Dh = C // num_heads
    kern = functools.partial(ln_qkv_kernel, inv_sqrt_dh=1.0 / math.sqrt(Dh))
    return pl.pallas_call(
        kern,
        out_shape=jax.ShapeDtypeStruct((3, B, T, C), jnp.bfloat16),
        grid=(B, T // t_tile, 3),
        in_specs=[
            pl.BlockSpec((1, t_tile, C), lambda b, i, n: (b, i, 0)),
            pl.BlockSpec((1, C), lambda b, i, n: (0, 0)),
            pl.BlockSpec((1, C), lambda b, i, n: (0, 0)),
            pl.BlockSpec((1, C, C), lambda b, i, n: (n, 0, 0)),   # one of Wq/Wk/Wv per step
            pl.BlockSpec((1, 1, C), lambda b, i, n: (n, 0, 0)),
        ],
        out_specs=pl.BlockSpec((1, 1, t_tile, C), lambda b, i, n: (n, b, i, 0)),
        scratch_shapes=[pltpu.VMEM((t_tile, C), jnp.bfloat16)],
        compiler_params=_mosaic_params(("parallel", "parallel", "arbitrary")),
    )(x, p["ln1_g"], p["ln1_b"], p["wqkv"], p["bqkv"])


# ---------------- kernel B: flash attention (context only, no Wo) -------------

def attn_kernel(q_ref, k_ref, v_ref, ctx_ref, m_sc, l_sc, acc_sc,
                *, tq, tkv, num_heads, head_dim):
    i = pl.program_id(1)
    j = pl.program_id(2)
    nj = pl.num_programs(2)
    H, Dh = num_heads, head_dim

    @pl.when(j == 0)
    def _():
        m_sc[...] = jnp.full_like(m_sc, -jnp.inf)
        l_sc[...] = jnp.zeros_like(l_sc)
        acc_sc[...] = jnp.zeros_like(acc_sc)

    def split_heads(x2d):      # (t, C) -> (H, t, Dh) via static lane slices + leading stack
        return jnp.stack([x2d[:, h * Dh:(h + 1) * Dh] for h in range(H)], axis=0)

    def scores():              # Q already carries the 1/sqrt(Dh) scale
        q = split_heads(q_ref[0, 0])
        k = split_heads(k_ref[0, 0])
        return jnp.einsum("hqd,hkd->hqk", q, k, preferred_element_type=jnp.float32)

    def online_softmax_update(s):
        m_prev = m_sc[...]
        m_new = jnp.maximum(m_prev, jnp.max(s, axis=-1, keepdims=True))
        alpha = jnp.exp(m_prev - m_new)
        p = jnp.exp(s - m_new)
        l_sc[...] = alpha * l_sc[...] + jnp.sum(p, axis=-1, keepdims=True)
        v = split_heads(v_ref[0, 0])
        acc_sc[...] = alpha * acc_sc[...] + jnp.einsum(
            "hqk,hkd->hqd", p.astype(jnp.bfloat16), v, preferred_element_type=jnp.float32)
        m_sc[...] = m_new

    @pl.when(j < i)            # fully below the diagonal: no mask work
    def _():
        online_softmax_update(scores())

    @pl.when(j == i)           # diagonal tile: only place the causal mask is built
    def _():
        s = scores()
        rows = jax.lax.broadcasted_iota(jnp.int32, (tq, tkv), 0)
        cols = jax.lax.broadcasted_iota(jnp.int32, (tq, tkv), 1)
        s = jnp.where((cols > rows)[None, :, :], -1e30, s)
        online_softmax_update(s)

    # j > i tiles contribute nothing; their K/V index_map is clamped, so no DMA either.

    @pl.when(j == nj - 1)
    def _():
        inv_l = pl.reciprocal(l_sc[...], approx=True)                 # EUP slot
        ctx = acc_sc[...] * inv_l                                     # (H, tq, Dh) f32
        ctx2d = jnp.concatenate([ctx[h] for h in range(H)], axis=-1)  # (tq, C) lane-dense
        ctx_ref[0] = ctx2d.astype(ctx_ref.dtype)


def run_attention(qkv, num_heads, t_tile):
    _, B, T, C = qkv.shape
    Dh = C // num_heads
    n_t = T // t_tile
    kern = functools.partial(attn_kernel, tq=t_tile, tkv=t_tile,
                             num_heads=num_heads, head_dim=Dh)
    return pl.pallas_call(
        kern,
        out_shape=jax.ShapeDtypeStruct((B, T, C), jnp.bfloat16),
        grid=(B, n_t, n_t),
        in_specs=[
            pl.BlockSpec((1, 1, t_tile, C), lambda b, i, j: (0, b, i, 0)),                  # Q
            pl.BlockSpec((1, 1, t_tile, C), lambda b, i, j: (1, b, jnp.minimum(i, j), 0)),  # K
            pl.BlockSpec((1, 1, t_tile, C), lambda b, i, j: (2, b, jnp.minimum(i, j), 0)),  # V
        ],
        out_specs=pl.BlockSpec((1, t_tile, C), lambda b, i, j: (b, i, 0)),
        scratch_shapes=[
            pltpu.VMEM((num_heads, t_tile, 1), jnp.float32),   # running max
            pltpu.VMEM((num_heads, t_tile, 1), jnp.float32),   # running sum
            pltpu.VMEM((num_heads, t_tile, Dh), jnp.float32),  # context accumulator
        ],
        compiler_params=_mosaic_params(("parallel", "parallel", "arbitrary")),
    )(qkv, qkv, qkv)


# -------- kernel C: output proj + residual + LN2 + F-tiled MLP + residual -----

def proj_mlp_kernel(x_ref, ctx_ref, wo_ref, bo_ref, g_ref, b_ref,
                    w1_ref, b1_ref, w2_ref, b2_ref, o_ref, xn_sc, acc_sc):
    f = pl.program_id(2)
    nf = pl.num_programs(2)

    @pl.when(f == 0)
    def _():
        # single full-depth (tq,C)x(C,C) output projection + residual
        x_attn = (x_ref[0].astype(jnp.float32) + bo_ref[0]
                  + jnp.dot(ctx_ref[0], wo_ref[...], preferred_element_type=jnp.float32))
        acc_sc[...] = x_attn + b2_ref[0]           # residual + MLP output bias
        xn_sc[...] = _layer_norm(x_attn, g_ref[0], b_ref[0]).astype(jnp.bfloat16)

    h1 = jnp.dot(xn_sc[...], w1_ref[...],
                 preferred_element_type=jnp.float32) + b1_ref[0]
    # TODO(synk): PyTorch nn.GELU default is exact (erf); tanh approximation kept (Mosaic-safe).
    h1 = jax.nn.gelu(h1, approximate=True)
    acc_sc[...] += jnp.dot(h1.astype(jnp.bfloat16), w2_ref[...],
                           preferred_element_type=jnp.float32)

    @pl.when(f == nf - 1)
    def _():
        o_ref[0] = acc_sc[...].astype(o_ref.dtype)


def run_proj_mlp(x, ctx, p, t_tile, f_tile):
    B, T, C = x.shape
    F = p["w1"].shape[1]
    # TODO(synk): for very large C on v7x, Wo (C,C) should itself be column-tiled.
    return pl.pallas_call(
        proj_mlp_kernel,
        out_shape=jax.ShapeDtypeStruct((B, T, C), jnp.float32),
        grid=(B, T // t_tile, F // f_tile),
        in_specs=[
            pl.BlockSpec((1, t_tile, C), lambda b, i, f: (b, i, 0)),   # pre-attention residual
            pl.BlockSpec((1, t_tile, C), lambda b, i, f: (b, i, 0)),   # attention context (bf16)
            pl.BlockSpec((C, C), lambda b, i, f: (0, 0)),              # Wo
            pl.BlockSpec((1, C), lambda b, i, f: (0, 0)),              # bo
            pl.BlockSpec((1, C), lambda b, i, f: (0, 0)),              # ln2 gamma
            pl.BlockSpec((1, C), lambda b, i, f: (0, 0)),              # ln2 beta
            pl.BlockSpec((C, f_tile), lambda b, i, f: (0, f)),
            pl.BlockSpec((1, f_tile), lambda b, i, f: (0, f)),
            pl.BlockSpec((f_tile, C), lambda b, i, f: (f, 0)),
            pl.BlockSpec((1, C), lambda b, i, f: (0, 0)),
        ],
        out_specs=pl.BlockSpec((1, t_tile, C), lambda b, i, f: (b, i, 0)),
        scratch_shapes=[
            pltpu.VMEM((t_tile, C), jnp.bfloat16),   # LN2(x_attn), reused across F tiles
            pltpu.VMEM((t_tile, C), jnp.float32),    # output accumulator
        ],
        compiler_params=_mosaic_params(("parallel", "parallel", "arbitrary")),
    )(x, ctx, p["wo"], p["bo"], p["ln2_g"], p["ln2_b"],
      p["w1"], p["b1"], p["w2"], p["b2"])


# ------------------------------ final LayerNorm ------------------------------

def ln_f_kernel(x_ref, g_ref, b_ref, o_ref):
    o_ref[0] = _layer_norm(x_ref[0], g_ref[0], b_ref[0]).astype(o_ref.dtype)


def run_ln_f(x, g, b, t_tile):
    B, T, C = x.shape
    return pl.pallas_call(
        ln_f_kernel,
        out_shape=jax.ShapeDtypeStruct((B, T, C), jnp.float32),
        grid=(B, T // t_tile),
        in_specs=[pl.BlockSpec((1, t_tile, C), lambda b, i: (b, i, 0)),
                  pl.BlockSpec((1, C), lambda b, i: (0, 0)),
                  pl.BlockSpec((1, C), lambda b, i: (0, 0))],
        out_specs=pl.BlockSpec((1, t_tile, C), lambda b, i: (b, i, 0)),
        compiler_params=_mosaic_params(("parallel", "parallel")),
    )(x, g, b)


# --------------------------- full backbone (wrapper) -------------------------

def gpt_backbone_forward(input_ids, params, num_heads):
    B, T = input_ids.shape
    F = params["blocks"][0]["w1"].shape[1]
    t_tile = _pick_tile(T, 256)                  # quantum >= 16 preferred (bf16 sublane packing)
    f_tile = _pick_tile(F, 512, quanta=(128,))
    # Embedding: token lookup + positional embedding (gather stays in plain JAX glue).
    x = params["tok_emb"][input_ids] + params["pos_emb"][:T][None, :, :]
    x = x.astype(jnp.float32)
    for blk in params["blocks"]:
        qkv = run_ln_qkv(x, blk, num_heads, t_tile)       # (3, B, T, C) bf16, lane-dense
        ctx = run_attention(qkv, num_heads, t_tile)       # (B, T, C) bf16
        x = run_proj_mlp(x, ctx, blk, t_tile, f_tile)     # f32 residual stream
    return run_ln_f(x, params["ln_f_g"], params["ln_f_b"], t_tile)


# ------------------------------ parameter init --------------------------------

def init_params(key, vocab_size, embed_dim, max_seq_len, ff_dim, num_layers):
    C, F = embed_dim, ff_dim
    keys = iter(jax.random.split(key, 2 + num_layers * 4))

    def wf32(shape):
        return (0.02 * jax.random.normal(next(keys), shape)).astype(jnp.float32)

    def wbf16(shape):
        return wf32(shape).astype(jnp.bfloat16)

    params = {
        "tok_emb": wf32((vocab_size, C)),
        "pos_emb": wf32((max_seq_len, C)),
        "ln_f_g": jnp.ones((1, C), jnp.float32),
        "ln_f_b": jnp.zeros((1, C), jnp.float32),
        "blocks": [],
    }
    for _ in range(num_layers):
        blk = {
            "ln1_g": jnp.ones((1, C), jnp.float32),
            "ln1_b": jnp.zeros((1, C), jnp.float32),
            "wqkv": wbf16((3, C, C)),                     # stacked Wq / Wk / Wv
            "bqkv": jnp.zeros((3, 1, C), jnp.float32),
            "wo": wbf16((C, C)),
            "bo": jnp.zeros((1, C), jnp.float32),
            "ln2_g": jnp.ones((1, C), jnp.float32),
            "ln2_b": jnp.zeros((1, C), jnp.float32),
            "w1": wbf16((C, F)),
            "b1": jnp.zeros((1, F), jnp.float32),
            "w2": wbf16((F, C)),
            "b2": jnp.zeros((1, C), jnp.float32),
        }
        params["blocks"].append(blk)
    return params


# --------------------------- pure-JAX reference -------------------------------
# Mirrors the kernel's bf16 matmul precision (and Q-folded scale) so the comparison
# isolates kernel bugs.

def _ref_block(x, p, num_heads):
    B, T, C = x.shape
    H, Dh = num_heads, C // num_heads
    xn = _layer_norm(x, p["ln1_g"][0], p["ln1_b"][0]).astype(jnp.bfloat16)

    def proj(n):
        return jnp.einsum("btc,cd->btd", xn, p["wqkv"][n],
                          preferred_element_type=jnp.float32) + p["bqkv"][n, 0]

    q = (proj(0) * (Dh ** -0.5)).astype(jnp.bfloat16)     # scale folded into Q, as in kernel
    k = proj(1).astype(jnp.bfloat16)
    v = proj(2).astype(jnp.bfloat16)
    q = q.reshape(B, T, H, Dh).transpose(0, 2, 1, 3)
    k = k.reshape(B, T, H, Dh).transpose(0, 2, 1, 3)
    v = v.reshape(B, T, H, Dh).transpose(0, 2, 1, 3)
    s = jnp.einsum("bhtd,bhsd->bhts", q, k, preferred_element_type=jnp.float32)
    mask = jnp.tril(jnp.ones((T, T), bool))
    s = jnp.where(mask, s, -1e30)
    pa = jax.nn.softmax(s, axis=-1)
    ctx = jnp.einsum("bhts,bhsd->bhtd", pa.astype(jnp.bfloat16), v,
                     preferred_element_type=jnp.float32)
    ctx = ctx.transpose(0, 2, 1, 3).reshape(B, T, C).astype(jnp.bfloat16)
    x = x + jnp.einsum("btc,cd->btd", ctx, p["wo"],
                       preferred_element_type=jnp.float32) + p["bo"][0]
    xn2 = _layer_norm(x, p["ln2_g"][0], p["ln2_b"][0]).astype(jnp.bfloat16)
    h1 = jnp.einsum("btc,cf->btf", xn2, p["w1"],
                    preferred_element_type=jnp.float32) + p["b1"][0]
    h1 = jax.nn.gelu(h1, approximate=True)
    h2 = jnp.einsum("btf,fc->btc", h1.astype(jnp.bfloat16), p["w2"],
                    preferred_element_type=jnp.float32)
    return x + h2 + p["b2"][0]


def gpt_backbone_ref(input_ids, params, num_heads):
    T = input_ids.shape[1]
    x = params["tok_emb"][input_ids] + params["pos_emb"][:T][None]
    x = x.astype(jnp.float32)
    for blk in params["blocks"]:
        x = _ref_block(x, blk, num_heads)
    return _layer_norm(x, params["ln_f_g"][0], params["ln_f_b"][0])


# ------------------------------------ main -----------------------------------

if __name__ == "__main__":
    vocab_size, embed_dim, max_seq_len = 64, 32, 16
    num_heads, ff_dim, num_layers = 4, 64, 2
    B, T = 2, 8

    key = jax.random.PRNGKey(0)
    pkey, ikey = jax.random.split(key)
    params = init_params(pkey, vocab_size, embed_dim, max_seq_len, ff_dim, num_layers)
    input_ids = jax.random.randint(ikey, (B, T), 0, vocab_size, dtype=jnp.int32)

    out = gpt_backbone_forward(input_ids, params, num_heads)
    out = jax.block_until_ready(out)

    ref = gpt_backbone_ref(input_ids, params, num_heads)
    assert out.shape == (B, T, embed_dim)
    assert jnp.allclose(out, ref, atol=3e-2, rtol=3e-2), "mismatch vs. JAX reference"

    print("KERNEL_OK")
</pallas_src>

<mosaic_0001>
module attributes {stable_mosaic.version = 11 : i64} {
  func.func @ln_qkv_kernel(%arg0: i32, %arg1: i32, %arg2: i32, %arg3: memref<1x8x32xf32, #tpu.memory_space<vmem>>, %arg4: memref<1x32xf32, #tpu.memory_space<vmem>>, %arg5: memref<1x32xf32, #tpu.memory_space<vmem>>, %arg6: memref<1x32x32xbf16, #tpu.memory_space<vmem>>, %arg7: memref<1x1x32xf32, #tpu.memory_space<vmem>>, %arg8: memref<1x1x8x32xbf16, #tpu.memory_space<vmem>>, %arg9: memref<8x32xbf16, #tpu.memory_space<vmem>>) attributes {dimension_semantics = [#tpu.dimension_semantics<parallel>, #tpu.dimension_semantics<parallel>, #tpu.dimension_semantics<arbitrary>], iteration_bounds = array<i64: 2, 1, 3>, scalar_prefetch = 0 : i64, scratch_operands = 1 : i64, tpu.core_type = #tpu.core_type<tc>, window_params = [{transform_indices = @transform_0, window_bounds = array<i64: 1, 8, 32>}, {pipeline_mode = #tpu.pipeline_mode<synchronous>, transform_indices = @transform_1, window_bounds = array<i64: 1, 32>}, {pipeline_mode = #tpu.pipeline_mode<synchronous>, transform_indices = @transform_2, window_bounds = array<i64: 1, 32>}, {transform_indices = @transform_3, window_bounds = array<i64: 1, 32, 32>}, {transform_indices = @transform_4, window_bounds = array<i64: 1, 1, 32>}, {transform_indices = @transform_5, window_bounds = array<i64: 1, 1, 8, 32>}]} {
    %c0_i32 = arith.constant 0 : i32
    %0 = arith.cmpi eq, %arg2, %c0_i32 : i32
    %1 = arith.extui %0 : i1 to i32
    %c0_i32_0 = arith.constant 0 : i32
    %2 = arith.cmpi ne, %1, %c0_i32_0 : i32
    scf.if %2 {
      %c0_15 = arith.constant 0 : index
      %c0_16 = arith.constant 0 : index
      %c0_17 = arith.constant 0 : index
      %20 = vector.load %arg3[%c0_15, %c0_16, %c0_17] : memref<1x8x32xf32, #tpu.memory_space<vmem>>, vector<1x8x32xf32>
      %21 = vector.shape_cast %20 : vector<1x8x32xf32> to vector<8x32xf32>
      %c0_18 = arith.constant 0 : index
      %c0_19 = arith.constant 0 : index
      %22 = vector.load %arg4[%c0_18, %c0_19] : memref<1x32xf32, #tpu.memory_space<vmem>>, vector<1x32xf32>
      %23 = vector.shape_cast %22 : vector<1x32xf32> to vector<32xf32>
      %c0_20 = arith.constant 0 : index
      %c0_21 = arith.constant 0 : index
      %24 = vector.load %arg5[%c0_20, %c0_21] : memref<1x32xf32, #tpu.memory_space<vmem>>, vector<1x32xf32>
      %25 = vector.shape_cast %24 : vector<1x32xf32> to vector<32xf32>
      %cst_22 = arith.constant dense<0.000000e+00> : vector<8xf32>
      %26 = vector.multi_reduction <add>, %21, %cst_22 [1] : vector<8x32xf32> to vector<8xf32>
      %27 = vector.shape_cast %26 : vector<8xf32> to vector<8x1xf32>
      %cst_23 = arith.constant 3.200000e+01 : f32
      %28 = vector.broadcast %cst_23 : f32 to vector<8x1xf32>
      %29 = arith.divf %27, %28 : vector<8x1xf32>
      %30 = vector.broadcast %29 : vector<8x1xf32> to vector<8x32xf32>
      %31 = arith.subf %21, %30 : vector<8x32xf32>
      %32 = arith.mulf %31, %31 : vector<8x32xf32>
      %cst_24 = arith.constant dense<0.000000e+00> : vector<8xf32>
      %33 = vector.multi_reduction <add>, %32, %cst_24 [1] : vector<8x32xf32> to vector<8xf32>
      %34 = vector.shape_cast %33 : vector<8xf32> to vector<8x1xf32>
      %cst_25 = arith.constant 3.200000e+01 : f32
      %35 = vector.broadcast %cst_25 : f32 to vector<8x1xf32>
      %36 = arith.divf %34, %35 : vector<8x1xf32>
      %37 = vector.broadcast %29 : vector<8x1xf32> to vector<8x32xf32>
      %38 = arith.subf %21, %37 : vector<8x32xf32>
      %cst_26 = arith.constant 9.99999974E-6 : f32
      %39 = vector.broadcast %cst_26 : f32 to vector<8x1xf32>
      %40 = arith.addf %36, %39 : vector<8x1xf32>
      %41 = math.rsqrt %40 : vector<8x1xf32>
      %42 = vector.broadcast %41 : vector<8x1xf32> to vector<8x32xf32>
      %43 = arith.mulf %38, %42 : vector<8x32xf32>
      %44 = vector.shape_cast %23 : vector<32xf32> to vector<1x32xf32>
      %45 = vector.broadcast %44 : vector<1x32xf32> to vector<8x32xf32>
      %46 = arith.mulf %43, %45 : vector<8x32xf32>
      %47 = vector.shape_cast %25 : vector<32xf32> to vector<1x32xf32>
      %48 = vector.broadcast %47 : vector<1x32xf32> to vector<8x32xf32>
      %49 = arith.addf %46, %48 : vector<8x32xf32>
      %50 = arith.truncf %49 : vector<8x32xf32> to vector<8x32xbf16>
      %c0_27 = arith.constant 0 : index
      %c0_28 = arith.constant 0 : index
      %51 = vector.load %arg9[%c0_27, %c0_28] : memref<8x32xbf16, #tpu.memory_space<vmem>>, vector<8x32xbf16>
      tpu.vector_store %arg9[%c0_27, %c0_28], %50 {strides = array<i32>} : memref<8x32xbf16, #tpu.memory_space<vmem>>, vector<8x32xbf16>,
    } else {
    }
    %c0 = arith.constant 0 : index
    %c0_1 = arith.constant 0 : index
    %3 = vector.load %arg9[%c0, %c0_1] : memref<8x32xbf16, #tpu.memory_space<vmem>>, vector<8x32xbf16>
    %c0_2 = arith.constant 0 : index
    %c0_3 = arith.constant 0 : index
    %c0_4 = arith.constant 0 : index
    %4 = vector.load %arg6[%c0_2, %c0_3, %c0_4] : memref<1x32x32xbf16, #tpu.memory_space<vmem>>, vector<1x32x32xbf16>
    %5 = vector.shape_cast %4 : vector<1x32x32xbf16> to vector<32x32xbf16>
    %cst = arith.constant dense<0.000000e+00> : vector<8x32xf32>
    %6 = tpu.matmul %3, %5, %cst {dimension_numbers = #tpu.dot_dimension_numbers<[1], [0], [0], [1], [0, 0, 1, 1], [], []>} : vector<8x32xbf16>, vector<32x32xbf16>, vector<8x32xf32> -> vector<8x32xf32>
    %c0_5 = arith.constant 0 : index
    %c0_6 = arith.constant 0 : index
    %c0_7 = arith.constant 0 : index
    %7 = vector.load %arg7[%c0_5, %c0_6, %c0_7] : memref<1x1x32xf32, #tpu.memory_space<vmem>>, vector<1x1x32xf32>
    %8 = vector.shape_cast %7 : vector<1x1x32xf32> to vector<32xf32>
    %9 = vector.shape_cast %8 : vector<32xf32> to vector<1x32xf32>
    %10 = vector.broadcast %9 : vector<1x32xf32> to vector<8x32xf32>
    %11 = arith.addf %6, %10 : vector<8x32xf32>
    %c0_i32_8 = arith.constant 0 : i32
    %12 = arith.cmpi eq, %arg2, %c0_i32_8 : i32
    %cst_9 = arith.constant 0.353553385 : f32
    %cst_10 = arith.constant 1.000000e+00 : f32
    %13 = arith.select %12, %cst_9, %cst_10 : f32
    %14 = vector.broadcast %13 : f32 to vector<8x32xf32>
    %15 = arith.mulf %11, %14 : vector<8x32xf32>
    %16 = arith.truncf %15 : vector<8x32xf32> to vector<8x32xbf16>
    %c0_11 = arith.constant 0 : index
    %c0_12 = arith.constant 0 : index
    %c0_13 = arith.constant 0 : index
    %c0_14 = arith.constant 0 : index
    %17 = vector.load %arg8[%c0_11, %c0_12, %c0_13, %c0_14] : memref<1x1x8x32xbf16, #tpu.memory_space<vmem>>, vector<1x1x8x32xbf16>
    %18 = vector.shape_cast %17 : vector<1x1x8x32xbf16> to vector<8x32xbf16>
    %19 = vector.shape_cast %16 : vector<8x32xbf16> to vector<1x1x8x32xbf16>
    tpu.vector_store %arg8[%c0_11, %c0_12, %c0_13, %c0_14], %19 {strides = array<i32>} : memref<1x1x8x32xbf16, #tpu.memory_space<vmem>>, vector<1x1x8x32xbf16>,
    return
  }
  func.func @transform_0(%arg0: i32, %arg1: i32, %arg2: i32) -> (i32, i32, i32) {
    %c0_i32 = arith.constant 0 : i32
    %c0_i32_0 = arith.constant 0 : i32
    return %arg0, %arg1, %c0_i32 : i32, i32, i32
  }
  func.func @transform_1(%arg0: i32, %arg1: i32, %arg2: i32) -> (i32, i32) {
    %c0_i32 = arith.constant 0 : i32
    %c0_i32_0 = arith.constant 0 : i32
    %c0_i32_1 = arith.constant 0 : i32
    return %c0_i32, %c0_i32_0 : i32, i32
  }
  func.func @transform_2(%arg0: i32, %arg1: i32, %arg2: i32) -> (i32, i32) {
    %c0_i32 = arith.constant 0 : i32
    %c0_i32_0 = arith.constant 0 : i32
    %c0_i32_1 = arith.constant 0 : i32
    return %c0_i32, %c0_i32_0 : i32, i32
  }
  func.func @transform_3(%arg0: i32, %arg1: i32, %arg2: i32) -> (i32, i32, i32) {
    %c0_i32 = arith.constant 0 : i32
    %c0_i32_0 = arith.constant 0 : i32
    %c0_i32_1 = arith.constant 0 : i32
    return %arg2, %c0_i32, %c0_i32_0 : i32, i32, i32
  }
  func.func @transform_4(%arg0: i32, %arg1: i32, %arg2: i32) -> (i32, i32, i32) {
    %c0_i32 = arith.constant 0 : i32
    %c0_i32_0 = arith.constant 0 : i32
    %c0_i32_1 = arith.constant 0 : i32
    return %arg2, %c0_i32, %c0_i32_0 : i32, i32, i32
  }
  func.func @transform_5(%arg0: i32, %arg1: i32, %arg2: i32) -> (i32, i32, i32, i32) {
    %c0_i32 = arith.constant 0 : i32
    %c0_i32_0 = arith.constant 0 : i32
    return %arg2, %arg0, %arg1, %c0_i32 : i32, i32, i32, i32
  }
}

</mosaic_0001>

<bundles_post_ra>
// kernel: tpu_custom_call.1
= control target key start
LH: loop header
LB: loop body
LE: loop exit
PB: predicated region body
PF: predicated region fallthrough
CT: control target
= control target key end

     0   :  { %s1354_s0 = inlined_call_operand.hbm [shape: f32[2,8,32], index: 0, kind: input, shape index: {}]   ;;  %s1355_s1 = inlined_call_operand.vmem [shape: f32[1,32], index: 1, kind: input, shape index: {}]   ;;  %s1356_s2 = inlined_call_operand.vmem [shape: f32[1,32], index: 2, kind: input, shape index: {}]   ;;  %s1357_s3 = inlined_call_operand.hbm [shape: bf16[3,32,32], index: 3, kind: input, shape index: {}]   ;;  %s1358_s4 = inlined_call_operand.vmem [shape: f32[3,1,32], index: 4, kind: input, shape index: {}]   ;;  %s1359_s5 = inlined_call_operand.hbm [shape: bf16[3,2,8,32], index: 5, kind: output, shape index: {}]  }
   0x1   :  { %1373 = sst [smem:[#allocation20_spill]] %s1354_s0 }
   0x2   :  { %1374 = sst [smem:[#allocation21_spill]] %s1356_s2 }
   0x3   :  { %1375 = sst [smem:[#allocation22_spill]] %s1359_s5 }
   0x4   :  { %10 = vsyncpa [#allocation4], 0 }
   0x5   :  { %12 = vsyncpa [#allocation4 + $0x1], 0 }
   0x6   :  { %13 = vsyncpa [#allocation7], 0 }
   0x7   :  { %15 = vsyncpa [#allocation7 + $0x1], 0 }
   0x8   :  { %16 = vsyncpa [#allocation5], 0 }
   0x9   :  { %18 = vsyncpa [#allocation5 + $0x1], 0  ;;  %s996_s18 = smov 0   ;;  %s998_s19 = smov 0  }
   0xa   :  { %s1000_s20 = smov 0   ;;  %s1002_s21 = smov 0  }
   0xb   :  { %s1004_s22 = smov 0   ;;  %s1006_s23 = smov 0  }
   0xc   :  { %s1008_s24 = smov 0   ;;  %s1010_s25 = smov 0  }
   0xd   :  { %s1012_s26 = smov 0   ;;  %s1014_s27 = smov 0  }
   0xe   :  { %s1016_s28 = smov 0   ;;  %s1018_s29 = smov 0  }
   0xf   :  { %s1020_s30 = smov 0   ;;  %s1022_s6 = smov 0  }
  0x10 LB: > { %1376 = sst [smem:[#allocation12_spill]] %s905_s18  ;;  %s571_s7 = sadd.s32 4294967295, %s957_s6   ;;  %s957_s6 = sphi %s1022_s6, %s24_s6   ;;  %s953_s30 = sphi %s1020_s30, %s1413_s30   ;;  %s949_s29 = sphi %s1018_s29, %s1424_s29   ;;  %s945_s28 = sphi %s1016_s28, %s1411_s28   ;;  %s941_s27 = sphi %s1014_s27, %s1423_s27   ;;  %s937_s26 = sphi %s1012_s26, %s1422_s26   ;;  %s933_s25 = sphi %s1010_s25, %s1421_s25   ;;  %s929_s24 = sphi %s1008_s24, %s1420_s24   ;;  %s925_s23 = sphi %s1006_s23, %s1419_s23   ;;  %s921_s22 = sphi %s1004_s22, %s1418_s22   ;;  %s917_s21 = sphi %s1002_s21, %s1417_s21   ;;  %s913_s20 = sphi %s1000_s20, %s1416_s20   ;;  %s909_s19 = sphi %s998_s19, %s1415_s19   ;;  %s905_s18 = sphi %s996_s18, %s1414_s18  }
  0x11   : > { %1377 = sst [smem:[#allocation13_spill]] %s945_s28  ;;  %p59_p0 = scmp.ne.s32.totalorder %s937_s26, %s933_s25 }
  0x12   : > { %1378 = sst [smem:[#allocation14_spill]] %s953_s30  ;;  %p60_p1 = scmp.eq.s32.totalorder %s957_s6, 0 }
  0x13   : > { %1379 = sst [smem:[#allocation15_spill]] %s957_s6  ;;  %p65_p2 = scmp.ne.s32.totalorder %s933_s25, %s929_s24 }
  0x14   : > { %p66_p3 = scmp.eq.s32.totalorder %s571_s7, 0  ;;  %p127_p4 = scmp.ne.s32.totalorder %s925_s23, %s921_s22 }
  0x15   : > { %p1071_p5 = por %p60_p1, %p59_p0  ;;  %p133_p6 = scmp.ne.s32.totalorder %s921_s22, %s917_s21 }
  0x16   : > { %p1076_p7 = por %p66_p3, %p65_p2  ;;  %p129_p8 = por %p127_p4, %p60_p1 }
  0x17   : > { %p1080_p9 = por %p133_p6, %p66_p3  ;;  %p1084_p10 = scmp.eq.s32.totalorder %s571_s7, 5 }
  0x18   : > { %s1381_s11 = scalar_select %p1076_p7, 1, 0 }
  0x19   : > { %s1382_s12 = scalar_select %p1080_p9, 1, 0 }
  0x1a   : > { %p625_p11 = scmp.lt.s32.totalorder %s957_s6, 6  ;;  %s219_s14 = sand.u32 1, %s937_s26  }
  0x1b   : > { %s576_s15 = sshll.u32 %s953_s30, 7  ;;  %s575_s16 = sshll.u32 %s219_s14, 3 }
  0x1c   : > { %s1384_s0 = sld [smem:[#allocation20_spill]]  ;;  %s223_s9 = scalar_lea.vmem [#allocation3], %s575_s16 }
  0x1d   : > { %s231_s8 = sshll.u32 %s223_s9, 4  ;;  %p1098_p12 = pnand %p625_p11, %p1071_p5  ;;  %s1102_s8 = int_to_ptr.vmem [resolvable:$true] %s231_s8 }
  0x1e   : > { %p1104_p13 = pnand %p625_p11, %p129_p8 }
  0x1f   : > { %p749_p2 = pneg %p1098_p12 }
  0x20   : > { %s1386_s5 = scalar_select %p1104_p13, 1, 0 }
  0x22   : > { %s1094_s21 = scalar_lea.hbm %s1384_s0, %s576_s15  ;;  %s220_s15 = scalar_lea.sflag [#allocation4], %s219_s14 }
  0x23   : > { %s747_s17 = scalar_lea.hbm %s1094_s21, 128  ;;  %s752_s16 = scalar_lea.hbm %s1384_s0, 256 }
  0x24   : > { %p748_p1 = scmp.ne.s32.totalorder %s1094_s21, %s747_s17  ;;  %p753_p5 = scmp.lt.u32.totalorder %s1094_s21, %s1384_s0 }
  0x25   : > { %p754_p6 = scmp.lt.u32.totalorder %s752_s16, %s747_s17  ;;  %p756_p11 = scmp.lt.u32.totalorder %s747_s17, %s1094_s21 }
  0x26   : > { %p750_p3 = pnand %p749_p2, %p748_p1 }
  0x27   : > { %p755_p8 = por %p754_p6, %p753_p5 }
  0x28   : > { %p751_p4 = pneg %p750_p3 }
  0x29   : > { %p757_p0 = por %p756_p11, %p755_p8 }
  0x2b   : > { %p758_p9 = pnand %p757_p0, %p751_p4 }
  0x2d   : > { %761 = shalt.err (!%p758_p9)
}
  0x2e   : > { %s762_s14 = scalar_lea.vmem %s1102_s8, 128  ;;  %s959_s9 = smov [#allocation3]  }
  0x2f   : > { %p763_p1 = scmp.ne.s32.totalorder %s1102_s8, %s762_s14  ;;  %s767_s10 = sshll.u32 %s959_s9, 4  ;;  %s768_s10 = int_to_ptr.vmem [resolvable:$false] %s767_s10 }
  0x30   : > { %s769_s28 = scalar_lea.vmem %s768_s10, 256  ;;  %p770_p13 = scmp.lt.s32.totalorder %s1102_s8, %s768_s10 }
  0x31   : > { %p765_p3 = pnand %p763_p1, %p749_p2  ;;  %p771_p5 = scmp.lt.s32.totalorder %s769_s28, %s762_s14 }
  0x33   : > { %p766_p7 = pneg %p765_p3  ;;  %p772_p6 = por %p771_p5, %p770_p13 }
  0x35   : > { %p773_p8 = pnand %p772_p6, %p766_p7 }
  0x37   : > { %776 = shalt.err (!%p773_p8)
}
  0x38   : > { %617 = dma.hbm_to_vmem [thread:$0]  (!%p1098_p12), %s1094_s21, 128, %s1102_s8, %s220_s15  }
  0x39   : > { %p263_p7 = scmp.lt.s32.totalorder %s957_s6, 7  ;;  %p1387_p9 = scmp.ge.s32.totalorder %s957_s6, 1 }
  0x3a   : > { %s572_s17 = sadd.s32 4294967294, %s957_s6   ;;  %s36_s16 = sadd.s32 1, %s949_s29 }
  0x3b   : > { %p1137_p13 = pnand %p1387_p9, %p263_p7  ;;  %s120_s24 = sadd.s32 1, %s925_s23 }
  0x3c   : > { %p37_p0 = scmp.ge.s32.totalorder %s36_s16, 3  ;;  %s176_s14 = sadd.s32 1, %s913_s20 }
  0x3d   : > { %p186_p2 = scmp.ne.s32.totalorder %s913_s20, %s909_s19  ;;  %p192_p4 = scmp.ne.s32.totalorder %s909_s19, %s905_s18 }
  0x3e   : > { %s1426_s16 = smov (%p37_p0, %s36_s16), 0  ;;  %s1390_s8 = sadd.s32 1, %s953_s30 }
  0x3f   : > { %1389 = sst [smem:[#allocation16_spill]] %s1426_s16  ;;  %s1428_s8 = smov (!%p37_p0, %s1390_s8), %s953_s30 }
  0x40   : > { %s117_s21 = ssub.s32 %s949_s29, %s1426_s16  ;;  %p1158_p12 = por %p1084_p10, %p186_p2 }
  0x41   : > { %p45_p11 = scmp.ge.s32.totalorder %s1428_s8, 2  ;;  %p118_p1 = scmp.eq.s32.totalorder %s117_s21, 0 }
  0x42   : > { %s1391_s15 = scalar_select %p1158_p12, 1, 0 }
  0x43   : > { %p193_p3 = scmp.eq.s32.totalorder %s572_s17, 5  ;;  %s238_s9 = sand.u32 1, %s925_s23  }
  0x44   : > { %1392 = sst [smem:[#allocation17_spill]] %s1391_s15  ;;  %s1430_s8 = smov (%p45_p11, %s1428_s8), 0 }
  0x45   : > { %1393 = sst [smem:[#allocation18_spill]] %s1430_s8  ;;  %s47_s28 = ssub.s32 %s953_s30, %s1430_s8 }
  0x46   : > { %s1166_s10 = scalar_select %p118_p1, %s925_s23, %s120_s24  }
  0x47   : > { %p1170_p5 = por %p193_p3, %p192_p4  ;;  %p50_p10 = scmp.eq.s32.totalorder %s47_s28, 0 }
  0x48   : > { %1394 = sst [smem:[#allocation19_spill]] %s1166_s10  ;;  %s171_s13 = sor.u32 %s117_s21, %s47_s28 }
  0x49   : > { %s1395_s0 = scalar_select %p1170_p5, 1, 0 }
  0x4a   : > { %p174_p6 = scmp.eq.s32.totalorder %s171_s13, 0  ;;  %s1396_s16 = sadd.s32 1, %s937_s26 }
  0x4b   : > { %s1177_s18 = scalar_select %p50_p10, %s937_s26, %s1396_s16  }
  0x4c   : > { %s1180_s17 = scalar_select %p174_p6, %s913_s20, %s176_s14  }
  0x4d   : > { %s577_s6 = sshll.u32 %s238_s9, 4  ;;  %s596_s15 = sshll.u32 %s949_s29, 8 }
  0x4e   : > { %s1186_s8 = scalar_lea.hbm %s1357_s3, %s596_s15  ;;  %s242_s30 = scalar_lea.vmem [#allocation6], %s577_s6 }
  0x4f   : > { %s249_s10 = sshll.u32 %s242_s30, 4  ;;  %s1190_s21 = scalar_lea.sflag [#allocation7], %s238_s9  ;;  %s1188_s10 = int_to_ptr.vmem [resolvable:$true] %s249_s10 }
  0x50   : > { %s777_s16 = scalar_lea.hbm %s1186_s8, 256  ;;  %p1397_p7 = scmp.ne.s32.totalorder %s1386_s5, 0 }
  0x51   : > { %p778_p8 = scmp.ne.s32.totalorder %s1186_s8, %s777_s16  ;;  %s782_s15 = scalar_lea.hbm %s1357_s3, 768 }
  0x52   : > { %p779_p9 = pneg %p1397_p7  ;;  %p783_p4 = scmp.lt.u32.totalorder %s1186_s8, %s1357_s3 }
  0x53   : > { %p784_p11 = scmp.lt.u32.totalorder %s782_s15, %s777_s16  ;;  %p786_p3 = scmp.lt.u32.totalorder %s777_s16, %s1186_s8 }
  0x54   : > { %p780_p0 = pnand %p779_p9, %p778_p8 }
  0x55   : > { %p785_p1 = por %p784_p11, %p783_p4 }
  0x56   : > { %p781_p2 = pneg %p780_p0 }
  0x57   : > { %p787_p10 = por %p786_p3, %p785_p1 }
  0x59   : > { %p788_p6 = pnand %p787_p10, %p781_p2 }
  0x5b   : > { %791 = shalt.err (!%p788_p6)
}
  0x5c   : > { %s792_s30 = scalar_lea.vmem %s1188_s10, 256  ;;  %s960_s6 = smov [#allocation6]  }
  0x5d   : > { %p793_p8 = scmp.ne.s32.totalorder %s1188_s10, %s792_s30  ;;  %s797_s9 = sshll.u32 %s960_s6, 4  ;;  %s798_s9 = int_to_ptr.vmem [resolvable:$false] %s797_s9 }
  0x5e   : > { %s799_s24 = scalar_lea.vmem %s798_s9, 512  ;;  %p800_p12 = scmp.lt.s32.totalorder %s1188_s10, %s798_s9 }
  0x5f   : > { %p795_p0 = pnand %p793_p8, %p779_p9  ;;  %p801_p4 = scmp.lt.s32.totalorder %s799_s24, %s792_s30 }
  0x61   : > { %p796_p5 = pneg %p795_p0  ;;  %p802_p11 = por %p801_p4, %p800_p12 }
  0x63   : > { %p803_p1 = pnand %p802_p11, %p796_p5 }
  0x65   : > { %806 = shalt.err (!%p803_p1)
}
  0x66   : > { %s961_s16 = smov 64   ;;  %s962_s2 = smov 4  }
  0x67   : > { %620 = dma.hbm_to_vmem [thread:$0]  (!%p1397_p7), %s1186_s8, 256, %s1188_s10, %s1190_s21, %s961_s16, %s961_s16, %s962_s2  }
  0x68   : > { %267 = sbr.rel (%p1137_p13) target bundleno = 678 (0x2a6), region = 40  ;;  %s269_s14 = sand.u32 (!%p1137_p13), 1, %s933_s25  }
  0x69   : > { %s581_s15 = sshll.u32 (!%p1137_p13), %s269_s14, 3  ;;  %s270_s28 = scalar_lea.sflag (!%p1137_p13), [#allocation4], %s269_s14 }
  0x6a   : > { %s273_s13 = scalar_lea.vmem (!%p1137_p13), [#allocation3], %s581_s15  ;;  %p1398_p12 = scmp.ne.s32.totalorder (!%p1137_p13), %s1381_s11, 0 }
  0x6f   : > { %892 = dma.done.wait (%p1398_p12), %s270_s28, 128  }
  0x70   : > { %894 = vsyncadd (%p1398_p12), %s270_s28, 4294967168  ;;  %s278_s30 = sand.u32 1, %s921_s22   ;;  %p1399_p13 = scmp.ne.s32.totalorder %s1382_s12, 0 }
  0x71   : > { %s1226_s6 = sshll.u32 %s278_s30, 4  ;;  %s279_s5 = scalar_lea.sflag [#allocation7], %s278_s30 }
  0x72   : > { %s282_s7 = scalar_lea.vmem [#allocation6], %s1226_s6 }
  0x73   : > { %896 = dma.done.wait (%p1399_p13), %s279_s5, 256  }
  0x74   : > { %898 = vsyncadd (%p1399_p13), %s279_s5, 4294967040  ;;  %s314_s11 = sand.u32 1, %s909_s19   ;;  %p317_p5 = scmp.lt.s32.totalorder %s941_s27, 2 }
  0x75   : > { %s1237_s8 = sshll.u32 %s314_s11, 2  ;;  %p321_p7 = scmp.eq.s32.totalorder %s941_s27, 0 }
  0x76   : > { %s1241_s10 = scalar_select %p317_p5, %s941_s27, 2 }
  0x77   : > { %s316_s24 = scalar_lea.vmem [#allocation8], %s1237_s8  ;;  %p584_p9 = scmp.ne.s32.totalorder %s941_s27, 0 }
  0x78   : > { %s319_s12 = scalar_lea.vmem %s1358_s4, %s1241_s10  ;;  %v325_v0 = vld [vmem:[%s273_s13] sm:$0xff] (!%p584_p9)  ;;  %vm328_vm0 = vcmask (!%p584_p9), 261120   ;;  %v585_v11 = vld [vmem:[%s1355_s1] ss:$0 sm:$0xff] (!%p584_p9)  ;;  %s1400_s28 = sld [smem:[#allocation21_spill]] (!%p584_p9)  ;;  %vm358_vm1 = vcmask (!%p584_p9), 257024  }
  0x79   : > { %324 = sbr.rel (%p584_p9) target bundleno = 437 (0x1b5), region = 52  ;;  %v329_v1 = vsel (!%p584_p9), %vm328_vm0, %v325_v0, 0.0 }
  0x7a   : > { %330 = vadd.xlane.f32.xlu0 (!%p584_p9), %v329_v1 }
  0x7e   : > { %v586_v13 = vld [vmem:[%s1400_s28] ss:$0 sm:$0xff] (!%p584_p9) }
 0x107   : > { %v331_v2 = vpop.xlane.xlu0 %330 }
 0x108   : > { %v333_v3 = vmul.f32 0.03125, %v331_v2 }
 0x10a   : > { %v334_v4 = vsub.f32 %v325_v0, %v333_v3 }
 0x10c   : > { %v335_v5 = vmul.f32 %v334_v4, %v334_v4 }
 0x10e   : > { %v336_v6 = vsel %vm328_vm0, %v335_v5, 0.0 }
 0x10f   : > { %337 = vadd.xlane.f32.xlu0 %v336_v6 }
 0x19c   : > { %v338_v7 = vpop.xlane.xlu0 %337 }
 0x19d   : > { %v339_v8 = vmul.f32 0.03125, %v338_v7 }
 0x19f   : > { %v340_v9 = vadd.f32 1e-05, %v339_v8 }
 0x1a1   : > { %743 = vrsqrt.f32 %v340_v9 }
 0x1ab   : > { %v744_v10 = vpop.eup %743 }
 0x1ac   : > { %v342_v12 = vmul.f32 %v744_v10, %v334_v4 }
 0x1ae   : > { %v349_v14 = vmul.f32 %v585_v11, %v342_v12 }
 0x1b0   : > { %v356_v15 = vadd.f32 %v586_v13, %v349_v14 }
 0x1b2   : > { %v357_v16 = vpack.c.bf16 %v356_v15, %v356_v15 }
 0x1b4   : > { %359 = vst.msk [vmem:[#allocation2] sm:$0xf] %vm358_vm1, %v357_v16 }
 0x1b5 PF: > { %s1401_s13 = sld [smem:[#allocation13_spill]]  ;;  %v745_v17 = vld [vmem:[%s282_s7] sm:$0xff]   ;;  %v963_v18 = vmov 0.0   ;;  %v746_v19 = vld [vmem:[%s282_s7 + $0x8] sm:$0xff]   ;;  %vm964_vm2 = vmmov 0   ;;  %vm384_vm3 = vcmask 261120  }
 0x1b6   : > { %600 = vmatprep.subr.bf16.mxu0 %v963_v18  ;;  %604 = vmatprep.mubr.msk.bf16.mxu0 %vm964_vm2, %v963_v18  ;;  %s428_s30 = scalar_select %p321_p7, 0.35355338, 1.0  ;;  %v587_v21 = vld [vmem:[%s319_s12] ss:$0 sm:$0xff]  ;;  %vm432_vm4 = vcmask 257024  }
 0x1b7   : > { %601 = vmatpush3.bf16.msra.mxu0 %v745_v17  ;;  %s592_s5 = sshll.u32 %s941_s27, 1  ;;  %s1402_s7 = sld [smem:[#allocation17_spill]] }
 0x1b8   : > { %602 = vmatprep.subr.bf16.mxu0 %v963_v18  ;;  %v429_v23 = vstv %s428_s30  ;;  %s451_s2 = sshll.u32 %s316_s24, 4  ;;  %s1403_s10 = sld [smem:[#allocation22_spill]]  ;;  %s1275_s2 = int_to_ptr.vmem [resolvable:$true] %s451_s2 }
 0x1b9   : > { %s435_s12 = scalar_lea.sflag [#allocation5], %s314_s11  ;;  %s807_s28 = scalar_lea.vmem %s1275_s2, 64 }
 0x1ba   : > { %p808_p2 = scmp.ne.s32.totalorder %s1275_s2, %s807_s28 }
 0x1bb   : > { %603 = vmatpush3.bf16.msra.mxu0 %v746_v19  ;;  %v360_v20 = vld [vmem:[#allocation2] sm:$0xf]  ;;  %s447_s6 = sadd.s32 %s1401_s13, %s592_s5  ;;  %s965_s13 = smov [#allocation8]  }
 0x1bc   : > { %s593_s16 = sshll.u32 %s447_s6, 6  ;;  %s811_s30 = sshll.u32 %s965_s13, 4  ;;  %s812_s30 = int_to_ptr.vmem [resolvable:$false] %s811_s30 }
 0x1bd   : > { %p1404_p3 = scmp.ne.s32.totalorder %s1402_s7, 0  ;;  %s813_s5 = scalar_lea.vmem %s812_s30, 128 }
 0x1be   : > { %605 = vmatmul.mubr.msk.bf16.vlgmr.msra.gmra.mrb[0].mxu0 %vm384_vm3, %v360_v20  ;;  %s1273_s15 = scalar_lea.hbm %s1403_s10, %s593_s16  ;;  %p814_p8 = scmp.lt.s32.totalorder %s1275_s2, %s812_s30 }
 0x1bf   : > { %p809_p10 = pnand %p808_p2, %p1404_p3  ;;  %p815_p0 = scmp.lt.s32.totalorder %s813_s5, %s807_s28 }
 0x1c1   : > { %p810_p6 = pneg %p809_p10  ;;  %p816_p4 = por %p815_p0, %p814_p8 }
 0x1c3   : > { %p817_p11 = pnand %p816_p4, %p810_p6 }
 0x291   : > { %v422_v22 = vpop.f32.mrb[0].mxu0 }
 0x292   : > { %v423_v24 = vadd.f32 %v587_v21, %v422_v22  ;;  %v606_v25 = vpop.f32.mrb[1].mxu0 }
 0x293   : > { %v425_v26 = vpop.f32.mrb[2].mxu0 }
 0x294   : > { %v430_v27 = vmul.f32 %v429_v23, %v423_v24  ;;  %v607_v28 = vpop.f32.mrb[3].mxu0 }
 0x296   : > { %v431_v29 = vpack.c.bf16 %v430_v27, %v430_v27 }
 0x298   : > { %433 = vst.msk [vmem:[%s316_s24] sm:$0xf] %vm432_vm4, %v431_v29 }
 0x299   : > { %820 = shalt.err (!%p817_p11)
}
 0x29a   : > { %s821_s11 = scalar_lea.hbm %s1273_s15, 64  ;;  %s825_s21 = scalar_lea.hbm %s1403_s10, 384 }
 0x29b   : > { %p822_p1 = scmp.ne.s32.totalorder %s1273_s15, %s821_s11  ;;  %p826_p5 = scmp.lt.u32.totalorder %s1273_s15, %s1403_s10 }
 0x29c   : > { %p827_p7 = scmp.lt.u32.totalorder %s825_s21, %s821_s11  ;;  %p829_p2 = scmp.lt.u32.totalorder %s821_s11, %s1273_s15 }
 0x29d   : > { %p823_p12 = pnand %p822_p1, %p1404_p3 }
 0x29e   : > { %p828_p9 = por %p827_p7, %p826_p5 }
 0x29f   : > { %p824_p13 = pneg %p823_p12 }
 0x2a0   : > { %p830_p10 = por %p829_p2, %p828_p9 }
 0x2a2   : > { %p831_p6 = pnand %p830_p10, %p824_p13 }
 0x2a4   : > { %834 = shalt.err (!%p831_p6)
}
 0x2a5   : > { %612 = dma.vmem_to_hbm [thread:$0]  (%p1404_p3), %s1275_s2, 64, %s1273_s15, %s435_s12  }
 0x2a6 PF: > { %s1405_s16 = sld [smem:[#allocation15_spill]]  ;;  %s1406_s27 = sld [smem:[#allocation12_spill]] }
 0x2a7   : > { %p1407_p0 = scmp.ne.s32.totalorder %s1395_s0, 0 }
 0x2ac   : > { %p626_p8 = scmp.ge.s32.totalorder %s1405_s16, 2  ;;  %s463_s14 = sand.u32 1, %s1406_s27  }
 0x2ad   : > { %s464_s28 = scalar_lea.sflag [#allocation5], %s463_s14 }
 0x2ae   : > { %p622_p4 = pnand %p626_p8, %p1407_p0 }
 0x2b0   : > { %900 = dma.done.wait (!%p622_p4), %s464_s28, 64  }
 0x2b1   : > { %902 = vsyncadd (!%p622_p4), %s464_s28, 4294967232  ;;  %s24_s6 = sadd.s32 1, %s1405_s16   ;;  %s1409_s7 = sld [smem:[#allocation19_spill]] }
 0x2b2   : > { %p1307_p11 = scmp.ge.s32.totalorder %s24_s6, 8   ;;  %s1410_s2 = smov %s1177_s18 }
 0x2b3   : > { %s1411_s28 = sld [smem:[#allocation14_spill]]  ;;  %s1412_s0 = sld [smem:[#allocation16_spill]] }
 0x2b4   : > { %s1413_s30 = sld [smem:[#allocation18_spill]]  ;;  %s1414_s18 = smov %s909_s19 }
 0x2b5   : > { %s1415_s19 = smov %s913_s20  ;;  %s1416_s20 = smov %s1180_s17 }
 0x2b6   : > { %s1417_s21 = smov %s921_s22  ;;  %s1418_s22 = smov %s925_s23 }
 0x2b7   : > { %s1419_s23 = smov %s1409_s7  ;;  %s1420_s24 = smov %s933_s25 }
 0x2b8   : > { %s1421_s25 = smov %s937_s26  ;;  %s1422_s26 = smov %s1410_s2 }
 0x2b9   : > { %s1423_s27 = smov %s949_s29  ;;  %s1424_s29 = smov %s1412_s0 }
 0x2ba   :  { %23 = sbr.rel (!%p1307_p11) target bundleno = 16 (0x10), region = 105 }
 0x2c1   :  { %469 = vsyncpa [#allocation4], 1 }
 0x2c2   :  { %471 = vsyncpa [#allocation4 + $0x1], 1 }
 0x2c3   :  { %472 = vsyncpa [#allocation7], 1 }
 0x2c4   :  { %474 = vsyncpa [#allocation7 + $0x1], 1 }
 0x2c5   :  { %475 = vsyncpa [#allocation5], 1 }
 0x2c6   :  { %477 = vsyncpa [#allocation5 + $0x1], 1 }

</bundles_post_ra>
